<compile_context>
chip_gen: v5e
topology: v5e:2x2
jax: 0.10.0
libtpu: 0.0.40
codegen_flags: <defaults>
</compile_context>

<pallas_src>
import functools

import numpy as np
import jax
import jax.numpy as jnp
from jax.experimental import pallas as pl
from jax.experimental.pallas import tpu as pltpu


# ----------------------------------------------------------------------------
# Pallas kernel: HypoPeMlp forward for one (batch, ray-tile) grid point.
# All tensors are channels-first: x (in_dim, TN), intermediates (feat, TN).
#   x_ref  : (1, in_dim, TN)          rays (o|d concatenated on feat axis)
#   pe_ref : (P, in_dim)              constant posenc expansion (P = in_dim*ph)
#   w0c/w0s: (1, hidden, P)           first-layer weights split cos/sin
#   b0     : (1, hidden, 1)
#   w1     : (1, hidden, hidden), b1 (1, hidden, 1)
#   w2     : (1, out_dim, hidden), b2 (1, out_dim, 1)  (out_bias folded in)
#   o_ref  : (1, out_dim, TN)
# ----------------------------------------------------------------------------
def _hypo_pe_mlp_kernel(x_ref, pe_ref, w0c_ref, w0s_ref, b0_ref,
                        w1_ref, b1_ref, w2_ref, b2_ref, o_ref):
    x = x_ref[0]                                                    # (in_dim, TN)
    # positional encoding: xw[c*ph + f, n] = x[c, n] * freqs[f]  (MXU, tiny K)
    xw = jnp.dot(pe_ref[...], x, preferred_element_type=jnp.float32)  # (P, TN)
    cos_xw = jnp.cos(xw)
    sin_xw = jnp.sin(xw)
    # layer 0: split matmuls accumulate in f32 -> no [cos; sin] lane concat
    h = (jnp.dot(w0c_ref[0], cos_xw, preferred_element_type=jnp.float32)
         + jnp.dot(w0s_ref[0], sin_xw, preferred_element_type=jnp.float32)
         + b0_ref[0])
    h = jnp.maximum(h, 0.0)
    h = jnp.dot(w1_ref[0], h, preferred_element_type=jnp.float32) + b1_ref[0]
    h = jnp.maximum(h, 0.0)
    o_ref[0] = (jnp.dot(w2_ref[0], h, preferred_element_type=jnp.float32)
                + b2_ref[0])


def _choose_ray_tile(n_rays):
    """Largest lane-aligned ray tile up to 1024 (amortizes per-step overhead,
    bounds VMEM far below the v7x 64 MiB / 32 MiB-scoped limit)."""
    n128 = ((n_rays + 127) // 128) * 128
    return int(min(1024, n128))


def _pallas_hypo_mlp(xt, pe_mat, kparams, tile_n):
    # xt: (B, in_dim, N_pad) channels-first, N_pad % tile_n == 0
    B, in_dim, n_pad = xt.shape
    w0c, w0s, b0, w1t, b1, w2t, b2 = kparams
    out_dim = w2t.shape[1]

    ray_map = lambda b, n: (b, 0, n)     # stream ray tiles
    wgt_map = lambda b, n: (b, 0, 0)     # weights resident across the ray axis

    return pl.pallas_call(
        _hypo_pe_mlp_kernel,
        out_shape=jax.ShapeDtypeStruct((B, out_dim, n_pad), jnp.float32),
        grid_spec=pltpu.PrefetchScalarGridSpec(
            num_scalar_prefetch=0,
            grid=(B, n_pad // tile_n),
            in_specs=[
                pl.BlockSpec((1, in_dim, tile_n), ray_map),
                pl.BlockSpec(pe_mat.shape, lambda b, n: (0, 0)),
                pl.BlockSpec((1,) + w0c.shape[1:], wgt_map),
                pl.BlockSpec((1,) + w0s.shape[1:], wgt_map),
                pl.BlockSpec((1,) + b0.shape[1:], wgt_map),
                pl.BlockSpec((1,) + w1t.shape[1:], wgt_map),
                pl.BlockSpec((1,) + b1.shape[1:], wgt_map),
                pl.BlockSpec((1,) + w2t.shape[1:], wgt_map),
                pl.BlockSpec((1,) + b2.shape[1:], wgt_map),
            ],
            out_specs=pl.BlockSpec((1, out_dim, tile_n), ray_map),
        ),
        compiler_params=pltpu.CompilerParams(
            dimension_semantics=("parallel", "parallel"),
            vmem_limit_bytes=32 << 20,
        ),
    )(xt, pe_mat, w0c, w0s, b0, w1t, b1, w2t, b2)


def _prep_kernel_params(params, out_bias):
    """Transpose per-sample weights to (dout, din), split w0 into cos/sin
    halves, and fold out_bias into b2 (host-side glue over tiny arrays)."""
    P = params['w0'].shape[1] // 2
    w0t = jnp.swapaxes(params['w0'], 1, 2)            # (B, hidden, 2P)
    w0c = w0t[:, :, :P]
    w0s = w0t[:, :, P:]
    b0 = jnp.swapaxes(params['b0'], 1, 2)              # (B, hidden, 1)
    w1t = jnp.swapaxes(params['w1'], 1, 2)
    b1 = jnp.swapaxes(params['b1'], 1, 2)
    w2t = jnp.swapaxes(params['w2'], 1, 2)
    b2 = jnp.swapaxes(params['b2'], 1, 2) + jnp.float32(out_bias)
    return w0c, w0s, b0, w1t, b1, w2t, b2


# ----------------------------------------------------------------------------
# Hyponet (HypoPeMlp) apply: positional encoding + batched hyper-MLP
# ----------------------------------------------------------------------------
def hyponet_pe_mlp_apply(x, hyper, params):
    # x: (B, ..., in_dim) -- mirrors HypoPeMlp.forward
    B = x.shape[0]
    query_shape = x.shape[1:-1]
    in_dim = x.shape[-1]
    x = x.reshape(B, -1, in_dim)
    N = x.shape[1]

    # layout plumbing: put the ray axis on lanes (channels-first).
    xt = jnp.swapaxes(x, 1, 2)                          # (B, in_dim, N)
    tile_n = _choose_ray_tile(N)
    n_pad = -(-N // tile_n) * tile_n
    if n_pad != N:
        xt = jnp.pad(xt, ((0, 0), (0, 0), (0, n_pad - N)))

    kparams = _prep_kernel_params(params, hyper['out_bias'])
    out_t = _pallas_hypo_mlp(xt, hyper['pe_mat'], kparams, tile_n)
    out = jnp.swapaxes(out_t[:, :, :N], 1, 2)           # (B, N, out_dim)
    return out.reshape(B, *query_shape, -1)


def hyponet_pe_mlp_ref(x, hyper, params):
    """Pure-JAX reference (mirrors the PyTorch HypoMlp forward)."""
    B = x.shape[0]
    query_shape = x.shape[1:-1]
    x = x.reshape(B, -1, x.shape[-1])
    freqs = hyper['freqs']
    xw = (x[..., None] * freqs).reshape(B, x.shape[1], -1)
    h = jnp.concatenate([jnp.cos(xw), jnp.sin(xw)], axis=-1)
    h = jnp.maximum(jnp.einsum('bnd,bde->bne', h, params['w0']) + params['b0'], 0.0)
    h = jnp.maximum(jnp.einsum('bnd,bde->bne', h, params['w1']) + params['b1'], 0.0)
    out = jnp.einsum('bnd,bde->bne', h, params['w2']) + params['b2'] + hyper['out_bias']
    return out.reshape(B, *query_shape, -1)


# ----------------------------------------------------------------------------
# Hypernet setup (deterministic) + generate_params stand-in (plain JAX glue)
# ----------------------------------------------------------------------------
def init_base_nvs_hypernet(key, hyponet_spec, latent_dim=16):
    assert hyponet_spec['name'] == 'pe_mlp'
    args = hyponet_spec['args']
    depth, in_dim = args['depth'], args['in_dim']
    hidden, out_dim = args['hidden_dim'], args['out_dim']
    pe_dim, pe_sigma = args['pe_dim'], args['pe_sigma']
    assert depth == 3, "kernel specialised for depth == 3"
    ph = pe_dim // 2

    freqs_np = np.exp(np.linspace(0.0, np.log(pe_sigma), ph)).astype(np.float32)
    # constant posenc expansion matrix: pe_mat[c*ph + f, c] = freqs[f]
    pe_mat = np.zeros((in_dim * ph, in_dim), np.float32)
    for c in range(in_dim):
        pe_mat[c * ph:(c + 1) * ph, c] = freqs_np

    layer_dims = []
    last = in_dim * pe_dim
    for i in range(depth):
        cur = hidden if i < depth - 1 else out_dim
        layer_dims.append((last, cur))
        last = cur

    keys = jax.random.split(key, 2 + 2 * depth)
    hyper = {
        'hyponet_name': hyponet_spec['name'],
        'pe_dim': pe_dim,
        'out_bias': float(args['out_bias']),
        'freqs': jnp.asarray(freqs_np),
        'pe_mat': jnp.asarray(pe_mat),
        'layer_dims': layer_dims,
        'enc_w': jax.random.normal(keys[0], (9, latent_dim), jnp.float32) * 0.3,
        'enc_b': jnp.zeros((latent_dim,), jnp.float32),
    }
    for i, (din, dout) in enumerate(layer_dims):
        hyper[f'base_wb{i}'] = (jax.random.normal(keys[2 + 2 * i], (din + 1, dout),
                                                  jnp.float32) / np.sqrt(din))
        hyper[f'head_wb{i}'] = (jax.random.normal(keys[3 + 2 * i],
                                                  (latent_dim, (din + 1) * dout),
                                                  jnp.float32) * 0.05)
    return hyper


def generate_params(hyper, s_rays_o, s_rays_d, s_imgs):
    # TODO(synk): abstract in the base class; deterministic linear hypernet
    # stand-in: pooled support features -> latent -> per-layer weight deltas.
    B = s_imgs.shape[0]
    img_feat = jnp.mean(s_imgs, axis=(1, 3, 4))        # (B, 3)  NCHW pooling
    ro_feat = jnp.mean(s_rays_o, axis=(1, 2, 3))       # (B, 3)
    rd_feat = jnp.mean(s_rays_d, axis=(1, 2, 3))       # (B, 3)
    z = jnp.tanh(jnp.concatenate([img_feat, ro_feat, rd_feat], axis=-1)
                 @ hyper['enc_w'] + hyper['enc_b'])    # (B, latent)
    params = {}
    for i, (din, dout) in enumerate(hyper['layer_dims']):
        delta = (z @ hyper[f'head_wb{i}']).reshape(B, din + 1, dout)
        wb = hyper[f'base_wb{i}'][None] + 0.01 * delta  # (B, din+1, dout)
        params[f'w{i}'] = wb[:, :-1, :]                 # (B, din, dout)
        params[f'b{i}'] = wb[:, -1:, :]                 # (B, 1,   dout)
    return params


# ----------------------------------------------------------------------------
# BaseNvsHypernet.forward
# ----------------------------------------------------------------------------
def base_nvs_hypernet_forward(hyper, data, mode='default', use_ref=False, **kwargs):
    params = generate_params(hyper, data['support_rays_o'],
                             data['support_rays_d'], data['support_imgs'])
    q_rays_o, q_rays_d = data['query_rays_o'], data['query_rays_d']
    apply_fn = hyponet_pe_mlp_ref if use_ref else hyponet_pe_mlp_apply

    if hyper['hyponet_name'] == 'nerf':
        # TODO(synk): volume rendering path (utils.render_rays) not implemented.
        raise NotImplementedError("nerf hyponet path not implemented")

    if mode == 'default':
        pred = apply_fn(jnp.concatenate([q_rays_o, q_rays_d], axis=-1),
                        hyper, params)
    elif mode == 'batched_rendering':
        # The ray-tile grid axis inside the kernel already bounds VMEM
        # independently of the number of rays, so the Python chunk loop from
        # the PyTorch module (and its per-chunk launches / concatenates) is
        # unnecessary: one pallas_call covers all rays. `batch_size` kwarg is
        # accepted for interface compatibility but not needed.
        B = q_rays_o.shape[0]
        query_shape = q_rays_o.shape[1:-1]
        qo = q_rays_o.reshape(B, -1, 3)
        qd = q_rays_d.reshape(B, -1, 3)
        x = jnp.concatenate([qo, qd], axis=-1)
        pred = apply_fn(x, hyper, params).reshape(B, *query_shape, -1)
    else:
        raise ValueError(mode)
    return pred


# ----------------------------------------------------------------------------
if __name__ == "__main__":
    key = jax.random.PRNGKey(0)
    B, V, H, W = 2, 2, 8, 8

    hyponet_spec = {
        'name': 'pe_mlp',
        'args': dict(depth=3, in_dim=6, out_dim=3, hidden_dim=32,
                     use_pe=True, pe_dim=8, out_bias=0.5, pe_sigma=64.0),
    }

    k = jax.random.split(key, 6)
    data = {
        'support_rays_o': jax.random.normal(k[0], (B, V, H, W, 3), jnp.float32),
        'support_rays_d': jax.random.normal(k[1], (B, V, H, W, 3), jnp.float32),
        'support_imgs':   jax.random.normal(k[2], (B, V, 3, H, W), jnp.float32),
        'query_rays_o':   jax.random.normal(k[3], (B, H, W, 3), jnp.float32),
        'query_rays_d':   jax.random.normal(k[4], (B, H, W, 3), jnp.float32),
        'near': jnp.full((B,), 2.0, jnp.float32),
        'far':  jnp.full((B,), 6.0, jnp.float32),
    }

    hyper = init_base_nvs_hypernet(jax.random.PRNGKey(0), hyponet_spec)

    # Pallas kernel, default mode
    pred = base_nvs_hypernet_forward(hyper, data, mode='default')
    pred = jax.block_until_ready(pred)
    assert pred.shape == (B, H, W, 3), pred.shape
    assert bool(jnp.all(jnp.isfinite(pred)))

    # Pallas kernel, batched_rendering mode
    pred_batched = base_nvs_hypernet_forward(hyper, data,
                                             mode='batched_rendering',
                                             batch_size=24)
    pred_batched = jax.block_until_ready(pred_batched)

    # Pure-JAX reference
    pred_ref = jax.block_until_ready(
        base_nvs_hypernet_forward(hyper, data, mode='default', use_ref=True))

    np.testing.assert_allclose(np.asarray(pred), np.asarray(pred_ref),
                               rtol=2e-2, atol=2e-2)
    np.testing.assert_allclose(np.asarray(pred_batched), np.asarray(pred),
                               rtol=1e-4, atol=1e-4)

    print("KERNEL_OK")
</pallas_src>

<mosaic_0001>
module attributes {stable_mosaic.version = 11 : i64} {
  func.func @_hypo_pe_mlp_kernel(%arg0: i32, %arg1: i32, %arg2: memref<1x6x128xf32, #tpu.memory_space<vmem>>, %arg3: memref<24x6xf32, #tpu.memory_space<vmem>>, %arg4: memref<1x32x24xf32, #tpu.memory_space<vmem>>, %arg5: memref<1x32x24xf32, #tpu.memory_space<vmem>>, %arg6: memref<1x32x1xf32, #tpu.memory_space<vmem>>, %arg7: memref<1x32x32xf32, #tpu.memory_space<vmem>>, %arg8: memref<1x32x1xf32, #tpu.memory_space<vmem>>, %arg9: memref<1x3x32xf32, #tpu.memory_space<vmem>>, %arg10: memref<1x3x1xf32, #tpu.memory_space<vmem>>, %arg11: memref<1x3x128xf32, #tpu.memory_space<vmem>>) attributes {dimension_semantics = [#tpu.dimension_semantics<parallel>, #tpu.dimension_semantics<parallel>], iteration_bounds = array<i64: 2, 1>, scalar_prefetch = 0 : i64, scratch_operands = 0 : i64, tpu.core_type = #tpu.core_type<tc>, window_params = [{transform_indices = @transform_0, window_bounds = array<i64: 1, 6, 128>}, {pipeline_mode = #tpu.pipeline_mode<synchronous>, transform_indices = @transform_1, window_bounds = array<i64: 24, 6>}, {transform_indices = @transform_2, window_bounds = array<i64: 1, 32, 24>}, {transform_indices = @transform_3, window_bounds = array<i64: 1, 32, 24>}, {transform_indices = @transform_4, window_bounds = array<i64: 1, 32, 1>}, {transform_indices = @transform_5, window_bounds = array<i64: 1, 32, 32>}, {transform_indices = @transform_6, window_bounds = array<i64: 1, 32, 1>}, {transform_indices = @transform_7, window_bounds = array<i64: 1, 3, 32>}, {transform_indices = @transform_8, window_bounds = array<i64: 1, 3, 1>}, {transform_indices = @transform_9, window_bounds = array<i64: 1, 3, 128>}]} {
    %c0 = arith.constant 0 : index
    %c0_0 = arith.constant 0 : index
    %c0_1 = arith.constant 0 : index
    %0 = vector.load %arg2[%c0, %c0_0, %c0_1] : memref<1x6x128xf32, #tpu.memory_space<vmem>>, vector<1x6x128xf32>
    %1 = vector.shape_cast %0 : vector<1x6x128xf32> to vector<6x128xf32>
    %c0_2 = arith.constant 0 : index
    %c0_3 = arith.constant 0 : index
    %2 = vector.load %arg3[%c0_2, %c0_3] : memref<24x6xf32, #tpu.memory_space<vmem>>, vector<24x6xf32>
    %cst = arith.constant dense<0.000000e+00> : vector<24x128xf32>
    %3 = tpu.matmul %2, %1, %cst {dimension_numbers = #tpu.dot_dimension_numbers<[1], [0], [0], [1], [0, 0, 1, 1], [], []>} : vector<24x6xf32>, vector<6x128xf32>, vector<24x128xf32> -> vector<24x128xf32>
    %4 = math.cos %3 : vector<24x128xf32>
    %5 = math.sin %3 : vector<24x128xf32>
    %c0_4 = arith.constant 0 : index
    %c0_5 = arith.constant 0 : index
    %c0_6 = arith.constant 0 : index
    %6 = vector.load %arg4[%c0_4, %c0_5, %c0_6] : memref<1x32x24xf32, #tpu.memory_space<vmem>>, vector<1x32x24xf32>
    %7 = vector.shape_cast %6 : vector<1x32x24xf32> to vector<32x24xf32>
    %cst_7 = arith.constant dense<0.000000e+00> : vector<32x128xf32>
    %8 = tpu.matmul %7, %4, %cst_7 {dimension_numbers = #tpu.dot_dimension_numbers<[1], [0], [0], [1], [0, 0, 1, 1], [], []>} : vector<32x24xf32>, vector<24x128xf32>, vector<32x128xf32> -> vector<32x128xf32>
    %c0_8 = arith.constant 0 : index
    %c0_9 = arith.constant 0 : index
    %c0_10 = arith.constant 0 : index
    %9 = vector.load %arg5[%c0_8, %c0_9, %c0_10] : memref<1x32x24xf32, #tpu.memory_space<vmem>>, vector<1x32x24xf32>
    %10 = vector.shape_cast %9 : vector<1x32x24xf32> to vector<32x24xf32>
    %cst_11 = arith.constant dense<0.000000e+00> : vector<32x128xf32>
    %11 = tpu.matmul %10, %5, %cst_11 {dimension_numbers = #tpu.dot_dimension_numbers<[1], [0], [0], [1], [0, 0, 1, 1], [], []>} : vector<32x24xf32>, vector<24x128xf32>, vector<32x128xf32> -> vector<32x128xf32>
    %12 = arith.addf %8, %11 : vector<32x128xf32>
    %c0_12 = arith.constant 0 : index
    %c0_13 = arith.constant 0 : index
    %c0_14 = arith.constant 0 : index
    %13 = vector.load %arg6[%c0_12, %c0_13, %c0_14] : memref<1x32x1xf32, #tpu.memory_space<vmem>>, vector<1x32x1xf32>
    %14 = vector.shape_cast %13 : vector<1x32x1xf32> to vector<32x1xf32>
    %15 = vector.broadcast %14 : vector<32x1xf32> to vector<32x128xf32>
    %16 = arith.addf %12, %15 : vector<32x128xf32>
    %cst_15 = arith.constant 0.000000e+00 : f32
    %17 = vector.broadcast %cst_15 : f32 to vector<32x128xf32>
    %18 = arith.maximumf %16, %17 : vector<32x128xf32>
    %c0_16 = arith.constant 0 : index
    %c0_17 = arith.constant 0 : index
    %c0_18 = arith.constant 0 : index
    %19 = vector.load %arg7[%c0_16, %c0_17, %c0_18] : memref<1x32x32xf32, #tpu.memory_space<vmem>>, vector<1x32x32xf32>
    %20 = vector.shape_cast %19 : vector<1x32x32xf32> to vector<32x32xf32>
    %cst_19 = arith.constant dense<0.000000e+00> : vector<32x128xf32>
    %21 = tpu.matmul %20, %18, %cst_19 {dimension_numbers = #tpu.dot_dimension_numbers<[1], [0], [0], [1], [0, 0, 1, 1], [], []>} : vector<32x32xf32>, vector<32x128xf32>, vector<32x128xf32> -> vector<32x128xf32>
    %c0_20 = arith.constant 0 : index
    %c0_21 = arith.constant 0 : index
    %c0_22 = arith.constant 0 : index
    %22 = vector.load %arg8[%c0_20, %c0_21, %c0_22] : memref<1x32x1xf32, #tpu.memory_space<vmem>>, vector<1x32x1xf32>
    %23 = vector.shape_cast %22 : vector<1x32x1xf32> to vector<32x1xf32>
    %24 = vector.broadcast %23 : vector<32x1xf32> to vector<32x128xf32>
    %25 = arith.addf %21, %24 : vector<32x128xf32>
    %cst_23 = arith.constant 0.000000e+00 : f32
    %26 = vector.broadcast %cst_23 : f32 to vector<32x128xf32>
    %27 = arith.maximumf %25, %26 : vector<32x128xf32>
    %c0_24 = arith.constant 0 : index
    %c0_25 = arith.constant 0 : index
    %c0_26 = arith.constant 0 : index
    %28 = vector.load %arg9[%c0_24, %c0_25, %c0_26] : memref<1x3x32xf32, #tpu.memory_space<vmem>>, vector<1x3x32xf32>
    %29 = vector.shape_cast %28 : vector<1x3x32xf32> to vector<3x32xf32>
    %cst_27 = arith.constant dense<0.000000e+00> : vector<3x128xf32>
    %30 = tpu.matmul %29, %27, %cst_27 {dimension_numbers = #tpu.dot_dimension_numbers<[1], [0], [0], [1], [0, 0, 1, 1], [], []>} : vector<3x32xf32>, vector<32x128xf32>, vector<3x128xf32> -> vector<3x128xf32>
    %c0_28 = arith.constant 0 : index
    %c0_29 = arith.constant 0 : index
    %c0_30 = arith.constant 0 : index
    %31 = vector.load %arg10[%c0_28, %c0_29, %c0_30] : memref<1x3x1xf32, #tpu.memory_space<vmem>>, vector<1x3x1xf32>
    %32 = vector.shape_cast %31 : vector<1x3x1xf32> to vector<3x1xf32>
    %33 = vector.broadcast %32 : vector<3x1xf32> to vector<3x128xf32>
    %34 = arith.addf %30, %33 : vector<3x128xf32>
    %c0_31 = arith.constant 0 : index
    %c0_32 = arith.constant 0 : index
    %c0_33 = arith.constant 0 : index
    %35 = vector.load %arg11[%c0_31, %c0_32, %c0_33] : memref<1x3x128xf32, #tpu.memory_space<vmem>>, vector<1x3x128xf32>
    %36 = vector.shape_cast %35 : vector<1x3x128xf32> to vector<3x128xf32>
    %37 = vector.shape_cast %34 : vector<3x128xf32> to vector<1x3x128xf32>
    tpu.vector_store %arg11[%c0_31, %c0_32, %c0_33], %37 {strides = array<i32>} : memref<1x3x128xf32, #tpu.memory_space<vmem>>, vector<1x3x128xf32>,
    return
  }
  func.func @transform_0(%arg0: i32, %arg1: i32) -> (i32, i32, i32) {
    %c0_i32 = arith.constant 0 : i32
    %c0_i32_0 = arith.constant 0 : i32
    return %arg0, %c0_i32, %arg1 : i32, i32, i32
  }
  func.func @transform_1(%arg0: i32, %arg1: i32) -> (i32, i32) {
    %c0_i32 = arith.constant 0 : i32
    %c0_i32_0 = arith.constant 0 : i32
    %c0_i32_1 = arith.constant 0 : i32
    return %c0_i32, %c0_i32_0 : i32, i32
  }
  func.func @transform_2(%arg0: i32, %arg1: i32) -> (i32, i32, i32) {
    %c0_i32 = arith.constant 0 : i32
    %c0_i32_0 = arith.constant 0 : i32
    %c0_i32_1 = arith.constant 0 : i32
    return %arg0, %c0_i32, %c0_i32_0 : i32, i32, i32
  }
  func.func @transform_3(%arg0: i32, %arg1: i32) -> (i32, i32, i32) {
    %c0_i32 = arith.constant 0 : i32
    %c0_i32_0 = arith.constant 0 : i32
    %c0_i32_1 = arith.constant 0 : i32
    return %arg0, %c0_i32, %c0_i32_0 : i32, i32, i32
  }
  func.func @transform_4(%arg0: i32, %arg1: i32) -> (i32, i32, i32) {
    %c0_i32 = arith.constant 0 : i32
    %c0_i32_0 = arith.constant 0 : i32
    %c0_i32_1 = arith.constant 0 : i32
    return %arg0, %c0_i32, %c0_i32_0 : i32, i32, i32
  }
  func.func @transform_5(%arg0: i32, %arg1: i32) -> (i32, i32, i32) {
    %c0_i32 = arith.constant 0 : i32
    %c0_i32_0 = arith.constant 0 : i32
    %c0_i32_1 = arith.constant 0 : i32
    return %arg0, %c0_i32, %c0_i32_0 : i32, i32, i32
  }
  func.func @transform_6(%arg0: i32, %arg1: i32) -> (i32, i32, i32) {
    %c0_i32 = arith.constant 0 : i32
    %c0_i32_0 = arith.constant 0 : i32
    %c0_i32_1 = arith.constant 0 : i32
    return %arg0, %c0_i32, %c0_i32_0 : i32, i32, i32
  }
  func.func @transform_7(%arg0: i32, %arg1: i32) -> (i32, i32, i32) {
    %c0_i32 = arith.constant 0 : i32
    %c0_i32_0 = arith.constant 0 : i32
    %c0_i32_1 = arith.constant 0 : i32
    return %arg0, %c0_i32, %c0_i32_0 : i32, i32, i32
  }
  func.func @transform_8(%arg0: i32, %arg1: i32) -> (i32, i32, i32) {
    %c0_i32 = arith.constant 0 : i32
    %c0_i32_0 = arith.constant 0 : i32
    %c0_i32_1 = arith.constant 0 : i32
    return %arg0, %c0_i32, %c0_i32_0 : i32, i32, i32
  }
  func.func @transform_9(%arg0: i32, %arg1: i32) -> (i32, i32, i32) {
    %c0_i32 = arith.constant 0 : i32
    %c0_i32_0 = arith.constant 0 : i32
    return %arg0, %c0_i32, %arg1 : i32, i32, i32
  }
}

</mosaic_0001>

<bundles_post_ra>
// kernel: tpu_custom_call.1
= control target key start
LH: loop header
LB: loop body
LE: loop exit
PB: predicated region body
PF: predicated region fallthrough
CT: control target
= control target key end

     0   :  { %s2026_s30 = smov 0   ;;  %s2028_s10 = smov 0   ;;  %s2504_s0 = inlined_call_operand.vmem [shape: f32[2,6,128], index: 0, kind: input, shape index: {}]   ;;  %s2505_s1 = inlined_call_operand.vmem [shape: f32[24,6], index: 1, kind: input, shape index: {}]   ;;  %s2506_s2 = inlined_call_operand.vmem [shape: f32[2,32,24], index: 2, kind: input, shape index: {}]   ;;  %s2507_s3 = inlined_call_operand.vmem [shape: f32[2,32,24], index: 3, kind: input, shape index: {}]   ;;  %s2508_s4 = inlined_call_operand.vmem [shape: f32[2,32,1], index: 4, kind: input, shape index: {}]   ;;  %s2509_s5 = inlined_call_operand.vmem [shape: f32[2,32,32], index: 5, kind: input, shape index: {}]   ;;  %s2510_s6 = inlined_call_operand.vmem [shape: f32[2,32,1], index: 6, kind: input, shape index: {}]   ;;  %s2511_s7 = inlined_call_operand.vmem [shape: f32[2,3,32], index: 7, kind: input, shape index: {}]   ;;  %s2512_s8 = inlined_call_operand.vmem [shape: f32[2,3,1], index: 8, kind: input, shape index: {}]   ;;  %s2513_s9 = inlined_call_operand.vmem [shape: f32[2,3,128], index: 9, kind: output, shape index: {}]  }
   0x1   :  { %s2030_s11 = smov 0  }
   0x2 LB: > { %s31_s12 = sadd.s32 1, %s1963_s10  ;;  %p1854_p0 = scmp.ge.s32.totalorder %s1967_s11, 1  ;;  %s1967_s11 = sphi %s2030_s11, %s19_s11   ;;  %s1963_s10 = sphi %s2028_s10, %s2525_s10   ;;  %s1959_s30 = sphi %s2026_s30, %s2524_s30  }
   0x3   : > { %p33_p1 = scmp.ge.s32.totalorder %s31_s12, 2  ;;  %p373_p2 = scmp.lt.s32.totalorder %s1967_s11, 3 }
   0x5   : > { %s2527_s12 = smov (%p33_p1, %s31_s12), 0  ;;  %p374_p3 = pnand %p1854_p0, %p373_p2 }
   0x6   : > { %p446_p4 = scmp.lt.s32.totalorder (!%p374_p3), %s1959_s30, 1 }
   0x7   : > { %377 = sbr.rel (%p374_p3) target bundleno = 757 (0x2f5), region = 56 }
   0xc   : > { %s2529_s30 = smov (!%p446_p4, %s1959_s30), 1  ;;  %vm507_vm0 = vcmask 1045504   ;;  %v494_v0 = vld [vmem:[%s2505_s1] sm:$0xff]  ;;  %vm497_vm1 = vcmask 48128   ;;  %v495_v2 = vld [vmem:[%s2505_s1 + $0x8] sm:$0xff]  ;;  %v496_v3 = vld [vmem:[%s2505_s1 + $0x10] sm:$0xff] }
   0xd   : > { %s1855_s13 = sshll.u32 %s2529_s30, 3  ;;  %v1969_v4 = vmov 0   ;;  %v1970_v24 = vmov 683565275   ;;  %v1971_v26 = vmov 2475754826  }
   0xe   : > { %s452_s16 = scalar_lea.vmem %s2504_s0, %s1855_s13  ;;  %1943 = vset.pattern.permute.xlu1 %v1969_v4  ;;  %1942 = vset.pattern.permute.xlu0 %v1969_v4  ;;  %v1972_v28 = vmov 2131351028   ;;  %v1973_v30 = vmov 2102212464   ;;  %v1974_v35 = vmov 920167782  }
   0xf   : > { %v493_v1 = vld [vmem:[%s452_s16] sm:$0x3f]  ;;  %1944 = vset.pattern.permute.xlu2 %v1969_v4  ;;  %v1975_v38 = vmov 1326507024   ;;  %s2338_s23 = sshll.u32 %s2529_s30, 5  ;;  %s2477_s22 = sshll.u32 %s2529_s30, 2 }
  0x10   : > { %1869 = vmatpush.msk.msra.mxu0 %vm507_vm0, %v493_v1  ;;  %s2360_s26 = scalar_lea.vmem %s2508_s4, %s2338_s23  ;;  %s2417_s29 = scalar_lea.vmem %s2510_s6, %s2338_s23 }
  0x11   : > { %1870 = vmatmul.msk.f32.vlgmr.msra.gmra.mxu0 %vm497_vm1, %v494_v0  ;;  %s2438_s15 = scalar_lea.vmem %s2506_s2, %s2338_s23  ;;  %s2444_s18 = scalar_lea.vmem %s2507_s3, %s2338_s23 }
  0x12   : > { %s472_s21 = scalar_lea.vmem %s2509_s5, %s2338_s23  ;;  %s481_s27 = scalar_lea.vmem %s2511_s7, %s2477_s22 }
  0x13   : > { %s492_s13 = scalar_lea.vmem %s2513_s9, %s2477_s22 }
  0x19   : > { %1871 = vmatmul.msk.f32.gmra.mxu0 %vm497_vm1, %v495_v2 }
  0x21   : > { %1872 = vmatmul.msk.f32.gmra.mxu0 %vm497_vm1, %v496_v3 }
  0x8e   : > { %v2062_v5 = vpop.f32.mrf.mxu0 }
  0x8f   : > { %v537_v6 = vand.u32 2147483647, %v2062_v5  ;;  %v540_v7 = vand.u32 2139095040, %v2062_v5 }
  0x91   : > { %v541_v8 = vshrl.u32 %v540_v7, 23  ;;  %v544_v9 = vand.u32 8388607, %v537_v6 }
  0x93   : > { %v1873_v10 = vadd.s32 4294967169, %v541_v8  ;;  %v545_v11 = vor.u32 8388608, %v544_v9 }
  0x95   : > { %v547_v12 = vadd.s32 1, %v1873_v10  ;;  %v2070_v14 = vshll.u32 %v545_v11, 8 }
  0x96   : > { %v2068_v13 = vpop.f32.mrf.mxu0 }
  0x97   : > { %vm548_vm2 = vcmp.gt.s32.totalorder %v547_v12, 0  ;;  %v691_v15 = vand.u32 2147483647, %v2068_v13  ;;  %v694_v17 = vand.u32 2139095040, %v2068_v13  ;;  %v586_v21 = vand.u32 65535, %v2070_v14 }
  0x98   : > { %v549_v16 = vsel %vm548_vm2, %v547_v12, 0  ;;  %v587_v60 = vshrl.u32 %v2070_v14, 16 }
  0x99   : > { %v551_v18 = vand.u32 31, %v549_v16  ;;  %v550_v19 = vshrl.u32 %v549_v16, 5  ;;  %v695_v22 = vshrl.u32 %v694_v17, 23  ;;  %v698_v23 = vand.u32 8388607, %v691_v15 }
  0x9b   : > { %v552_v20 = vsub.s32 32, %v551_v18  ;;  %v554_v25 = vshll.u32 %v1970_v24, %v551_v18  ;;  %v557_v27 = vshll.u32 %v1971_v26, %v551_v18  ;;  %v560_v29 = vshll.u32 %v1972_v28, %v551_v18 }
  0x9c   : > { %v563_v31 = vshll.u32 %v1973_v30, %v551_v18  ;;  %v566_v36 = vshll.u32 %v1974_v35, %v551_v18  ;;  %vm569_vm3 = vcmp.lt.s32.totalorder %v550_v19, 1  ;;  %vm570_vm4 = vcmp.lt.s32.totalorder %v550_v19, 2 }
  0x9d   : > { %v555_v32 = vshrl.u32 %v1971_v26, %v552_v20  ;;  %v558_v33 = vshrl.u32 %v1972_v28, %v552_v20  ;;  %v561_v34 = vshrl.u32 %v1973_v30, %v552_v20  ;;  %v564_v37 = vshrl.u32 %v1974_v35, %v552_v20 }
  0x9e   : > { %v567_v39 = vshrl.u32 %v1975_v38, %v552_v20  ;;  %v1876_v43 = vadd.s32 4294967169, %v695_v22  ;;  %v553_v44 = vshrl.u32 %v1970_v24, %v552_v20  ;;  %vm572_vm5 = vcmp.lt.s32.totalorder %v550_v19, 4 }
  0x9f   : > { %v556_v40 = vor.u32 %v555_v32, %v554_v25  ;;  %v559_v41 = vor.u32 %v558_v33, %v557_v27  ;;  %v562_v42 = vor.u32 %v561_v34, %v560_v29  ;;  %v565_v45 = vor.u32 %v564_v37, %v563_v31 }
  0xa0   : > { %v568_v46 = vor.u32 %v567_v39, %v566_v36  ;;  %vm571_vm6 = vcmp.lt.s32.totalorder %v550_v19, 3  ;;  %v699_v52 = vor.u32 8388608, %v698_v23  ;;  %v701_v53 = vadd.s32 1, %v1876_v43 }
  0xa1   : > { %v574_v47 = vsel %vm572_vm5, %v562_v42, 2102212464  ;;  %v577_v48 = vsel %vm569_vm3, %v556_v40, %v559_v41  ;;  %v581_v49 = vsel %vm569_vm3, %v559_v41, %v562_v42  ;;  %v578_v50 = vsel %vm572_vm5, %v565_v45, 920167782 }
  0xa2   : > { %v582_v51 = vsel %vm572_vm5, %v568_v46, 1326507024  ;;  %v573_v54 = vsel %vm569_vm3, %v553_v44, %v556_v40  ;;  %v575_v55 = vsel %vm571_vm6, %v559_v41, %v574_v47  ;;  %v579_v56 = vsel %vm571_vm6, %v562_v42, %v578_v50 }
  0xa3   : > { %v583_v57 = vsel %vm571_vm6, %v565_v45, %v582_v51  ;;  %v580_v58 = vsel %vm570_vm4, %v577_v48, %v579_v56  ;;  %vm702_vm7 = vcmp.gt.s32.totalorder %v701_v53, 0  ;;  %v2095_v1 = vsel %vm570_vm4, %v573_v54, %v575_v55 }
  0xa4   : > { %v584_v59 = vsel %vm570_vm4, %v581_v49, %v583_v57  ;;  %v610_v63 = vand.u32 65535, %v580_v58  ;;  %v611_v0 = vshrl.u32 %v580_v58, 16  ;;  %v703_v7 = vsel %vm702_vm7, %v701_v53, 0 }
  0xa5   : > { %v588_v61 = vand.u32 65535, %v584_v59  ;;  %v589_v62 = vshrl.u32 %v584_v59, 16  ;;  %v2097_v8 = vshll.u32 %v699_v52, 8  ;;  %v705_v31 = vand.u32 31, %v703_v7 }
  0xa6   : > { %v613_v11 = vmul.u32 %v611_v0, %v586_v21  ;;  %v614_v12 = vmul.u32 %v610_v63, %v587_v60  ;;  %v612_v18 = vmul.u32 %v610_v63, %v586_v21  ;;  %v615_v20 = vmul.u32 %v611_v0, %v587_v60 }
  0xa7   : > { %v591_v2 = vmul.u32 %v589_v62, %v586_v21  ;;  %v592_v3 = vmul.u32 %v588_v61, %v587_v60  ;;  %v590_v9 = vmul.u32 %v588_v61, %v586_v21  ;;  %v593_v10 = vmul.u32 %v589_v62, %v587_v60 }
  0xa8   : > { %v616_v25 = vshll.u32 %v613_v11, 16  ;;  %v617_v27 = vshrl.u32 %v613_v11, 16  ;;  %v618_v29 = vshll.u32 %v614_v12, 16  ;;  %v619_v33 = vshrl.u32 %v614_v12, 16 }
  0xa9   : > { %v594_v16 = vshll.u32 %v591_v2, 16  ;;  %v595_v17 = vshrl.u32 %v591_v2, 16  ;;  %v596_v22 = vshll.u32 %v592_v3, 16  ;;  %v597_v23 = vshrl.u32 %v592_v3, 16 }
  0xaa   : > { %vm620_vm9 = vc.u32 %v612_v18, %v616_v25  ;;  %v622_v34 = vadd.s32 %v616_v25, %v612_v18  ;;  %v2101_v39 = vsub.s32 32, %v705_v31  ;;  %v2104_v41 = vshrl.u32 %v703_v7, 5 }
  0xab   : > { %vm598_vm8 = vc.u32 %v590_v9, %v594_v16  ;;  %v600_v19 = vadd.s32 %v594_v16, %v590_v9  ;;  %v621_v37 = vsel %vm620_vm9, 1, %v1969_v4  ;;  %v708_v45 = vshll.u32 %v1970_v24, %v705_v31 }
  0xac   : > { %v599_v32 = vsel %vm598_vm8, 1, %v1969_v4  ;;  %v623_v40 = vadd.s32 %v621_v37, %v615_v20  ;;  %vm624_vm11 = vc.u32 %v622_v34, %v618_v29  ;;  %v2107_v44 = vadd.s32 %v622_v34, %v618_v29 }
  0xad   : > { %v601_v36 = vadd.s32 %v599_v32, %v593_v10  ;;  %vm602_vm10 = vc.u32 %v600_v19, %v596_v22  ;;  %v625_v43 = vsel %vm624_vm11, 1, %v1969_v4  ;;  %v709_v47 = vshrl.u32 %v1971_v26, %v2101_v39 }
  0xae   : > { %v603_v21 = vsel %vm602_vm10, 1, %v1969_v4  ;;  %v627_v46 = vadd.s32 %v625_v43, %v623_v40  ;;  %v711_v48 = vshll.u32 %v1971_v26, %v705_v31  ;;  %v712_v49 = vshrl.u32 %v1972_v28, %v2101_v39 }
  0xaf   : > { %v605_v42 = vadd.s32 %v603_v21, %v601_v36  ;;  %v714_v51 = vshll.u32 %v1972_v28, %v705_v31  ;;  %v715_v52 = vshrl.u32 %v1973_v30, %v2101_v39  ;;  %v717_v53 = vshll.u32 %v1973_v30, %v705_v31 }
  0xb0   : > { %v628_v54 = vadd.s32 %v627_v46, %v617_v27  ;;  %v2119_v55 = vor.u32 %v709_v47, %v708_v45  ;;  %v2121_v56 = vor.u32 %v712_v49, %v711_v48  ;;  %v718_v57 = vshrl.u32 %v1974_v35, %v2101_v39 }
  0xb1   : > { %v606_v50 = vadd.s32 %v605_v42, %v595_v17  ;;  %v716_v59 = vor.u32 %v715_v52, %v714_v51  ;;  %v720_v60 = vshll.u32 %v1974_v35, %v705_v31  ;;  %v721_v61 = vshrl.u32 %v1975_v38, %v2101_v39 }
  0xb2   : > { %v629_v62 = vadd.s32 %v628_v54, %v619_v33  ;;  %v630_v63 = vmul.u32 %v2070_v14, %v2095_v1  ;;  %v719_v0 = vor.u32 %v718_v57, %v717_v53  ;;  %vm723_vm13 = vcmp.lt.s32.totalorder %v2104_v41, 1  ;;  %v2142_v14 = vpop.f32.mrf.mxu0 }
  0xb3   : > { %v2125_v58 = vadd.s32 %v606_v50, %v597_v23  ;;  %v722_v2 = vor.u32 %v721_v61, %v720_v60  ;;  %v740_v3 = vand.u32 65535, %v2097_v8  ;;  %vm726_vm14 = vcmp.lt.s32.totalorder %v2104_v41, 4 }
  0xb4   : > { %v633_v7 = vadd.s32 1, %v629_v62  ;;  %v731_v9 = vsel %vm723_vm13, %v2119_v55, %v2121_v56  ;;  %v741_v10 = vshrl.u32 %v2097_v8, 16  ;;  %vm725_vm15 = vcmp.lt.s32.totalorder %v2104_v41, 3 }
  0xb5   : > { %vm632_vm12 = vc.u32 %v2125_v58, %v2107_v44  ;;  %v732_v1 = vsel %vm726_vm14, %v719_v0, 920167782  ;;  %v735_v11 = vsel %vm723_vm13, %v2121_v56, %v716_v59  ;;  %v736_v12 = vsel %vm726_vm14, %v722_v2, 1326507024 }
  0xb6   : > { %v634_v16 = vsel %vm632_vm12, %v633_v7, %v629_v62  ;;  %vm724_vm0 = vcmp.lt.s32.totalorder %v2104_v41, 2  ;;  %v733_v17 = vsel %vm725_vm15, %v716_v59, %v732_v1  ;;  %v737_v18 = vsel %vm725_vm15, %v719_v0, %v736_v12 }
  0xb7   : > { %v635_v20 = vadd.s32 %v634_v16, %v630_v63  ;;  %v734_v22 = vsel %vm724_vm0, %v731_v9, %v733_v17  ;;  %v738_v23 = vsel %vm724_vm0, %v735_v11, %v737_v18  ;;  %v848_v25 = vand.u32 2139095040, %v2142_v14 }
  0xb8   : > { %v742_v27 = vand.u32 65535, %v738_v23  ;;  %v743_v19 = vshrl.u32 %v738_v23, 16  ;;  %v764_v29 = vand.u32 65535, %v734_v22  ;;  %v765_v31 = vshrl.u32 %v734_v22, 16 }
  0xb9   : > { %v636_v32 = vadd.s32 536870912, %v635_v20  ;;  %v849_v45 = vshrl.u32 %v848_v25, 23  ;;  %v728_v63 = vsel %vm726_vm14, %v716_v59, 2102212464  ;;  %v707_v1 = vshrl.u32 %v1970_v24, %v2101_v39 }
  0xba   : > { %v745_v33 = vmul.u32 %v743_v19, %v740_v3  ;;  %v746_v34 = vmul.u32 %v742_v27, %v741_v10  ;;  %v767_v37 = vmul.u32 %v765_v31, %v740_v3  ;;  %v768_v21 = vmul.u32 %v764_v29, %v741_v10 }
  0xbb   : > { %v2162_v36 = vshrl.u32 %v636_v32, 30  ;;  %v744_v40 = vmul.u32 %v742_v27, %v740_v3  ;;  %v747_v42 = vmul.u32 %v743_v19, %v741_v10  ;;  %v766_v48 = vmul.u32 %v764_v29, %v740_v3 }
  0xbc   : > { %v748_v43 = vshll.u32 %v745_v33, 16  ;;  %v750_v47 = vshll.u32 %v746_v34, 16  ;;  %v770_v49 = vshll.u32 %v767_v37, 16  ;;  %v769_v51 = vmul.u32 %v765_v31, %v741_v10 }
  0xbd   : > { %v638_v46 = vshll.u32 %v2162_v36, 30  ;;  %v772_v52 = vshll.u32 %v768_v21, 16  ;;  %v1879_v62 = vadd.s32 4294967169, %v849_v45  ;;  %v845_v3 = vand.u32 2147483647, %v2142_v14 }
  0xbe   : > { %vm752_vm1 = vc.u32 %v744_v40, %v748_v43  ;;  %v754_v50 = vadd.s32 %v748_v43, %v744_v40  ;;  %vm774_vm2 = vc.u32 %v766_v48, %v770_v49  ;;  %v776_v57 = vadd.s32 %v770_v49, %v766_v48 }
  0xbf   : > { %v2165_v53 = vsub.s32 %v635_v20, %v638_v46  ;;  %v753_v54 = vsel %vm752_vm1, 1, %v1969_v4  ;;  %v775_v61 = vsel %vm774_vm2, 1, %v1969_v4  ;;  %v749_v9 = vshrl.u32 %v745_v33, 16 }
  0xc0   : > { %v755_v60 = vadd.s32 %v753_v54, %v747_v42  ;;  %vm756_vm3 = vc.u32 %v754_v50, %v750_v47  ;;  %v777_v2 = vadd.s32 %v775_v61, %v769_v51  ;;  %vm778_vm4 = vc.u32 %v776_v57, %v772_v52 }
  0xc1   : > { %v757_v0 = vsel %vm756_vm3, 1, %v1969_v4  ;;  %v641_v7 = vsub.s32 0, %v2165_v53  ;;  %vm640_vm5 = vcmp.lt.s32.totalorder %v2165_v53, 0  ;;  %v779_v11 = vsel %vm778_vm4, 1, %v1969_v4 }
  0xc2   : > { %v759_v10 = vadd.s32 %v757_v0, %v755_v60  ;;  %v855_v12 = vadd.s32 1, %v1879_v62  ;;  %v751_v16 = vshrl.u32 %v746_v34, 16  ;;  %v771_v17 = vshrl.u32 %v767_v37, 16 }
  0xc3   : > { %v781_v18 = vadd.s32 %v779_v11, %v777_v2  ;;  %v727_v20 = vsel %vm723_vm13, %v707_v1, %v2119_v55  ;;  %v729_v22 = vsel %vm725_vm15, %v2121_v56, %v728_v63  ;;  %v773_v23 = vshrl.u32 %v768_v21, 16 }
  0xc4   : > { %v760_v59 = vadd.s32 %v759_v10, %v749_v9  ;;  %vm856_vm6 = vcmp.gt.s32.totalorder %v855_v12, 0  ;;  %v642_v25 = vsel %vm640_vm5, %v641_v7, %v2165_v53  ;;  %v2187_v29 = vadd.s32 %v776_v57, %v772_v52 }
  0xc5   : > { %v782_v27 = vadd.s32 %v781_v18, %v771_v17  ;;  %v857_v19 = vsel %vm856_vm6, %v855_v12, 0  ;;  %v852_v31 = vand.u32 8388607, %v845_v3  ;;  %v730_v55 = vsel %vm724_vm0, %v727_v20, %v729_v22 }
  0xc6   : > { %v2185_v39 = vadd.s32 %v760_v59, %v751_v16  ;;  %v859_v32 = vand.u32 31, %v857_v19  ;;  %v643_v34 = vclz %v642_v25  ;;  %v784_v21 = vmul.u32 %v2097_v8, %v730_v55 }
  0xc7   : > { %v783_v33 = vadd.s32 %v782_v27, %v773_v23  ;;  %v853_v40 = vor.u32 8388608, %v852_v31  ;;  %v2206_v50 = vshrl.u32 %v857_v19, 5  ;;  %vm693_vm4 = vcmp.lt.s32.totalorder %v2068_v13, 0 }
  0xc8   : > { %vm786_vm7 = vc.u32 %v2185_v39, %v2187_v29  ;;  %v2195_v56 = vsub.s32 32, %v859_v32  ;;  %v862_v41 = vshll.u32 %v1970_v24, %v859_v32  ;;  %v865_v46 = vshll.u32 %v1971_v26, %v859_v32 }
  0xc9   : > { %v787_v37 = vadd.s32 1, %v783_v33  ;;  %v1874_v48 = vadd.s32 4294967294, %v643_v34  ;;  %v868_v8 = vshll.u32 %v1972_v28, %v859_v32  ;;  %v871_v54 = vshll.u32 %v1973_v30, %v859_v32 }
  0xca   : > { %v863_v42 = vshrl.u32 %v1971_v26, %v2195_v56  ;;  %v866_v43 = vshrl.u32 %v1972_v28, %v2195_v56  ;;  %v869_v47 = vshrl.u32 %v1973_v30, %v2195_v56  ;;  %v872_v57 = vshrl.u32 %v1974_v35, %v2195_v56 }
  0xcb   : > { %v788_v45 = vsel %vm786_vm7, %v787_v37, %v783_v33  ;;  %v874_v61 = vshll.u32 %v1974_v35, %v859_v32  ;;  %v875_v62 = vshrl.u32 %v1975_v38, %v2195_v56  ;;  %vm877_vm8 = vcmp.lt.s32.totalorder %v2206_v50, 1 }
  0xcc   : > { %v789_v49 = vadd.s32 %v788_v45, %v784_v21  ;;  %v2209_v51 = vor.u32 %v863_v42, %v862_v41  ;;  %v2211_v52 = vor.u32 %v866_v43, %v865_v46  ;;  %v2216_v26 = vor.u32 %v869_v47, %v868_v8 }
  0xcd   : > { %v873_v63 = vor.u32 %v872_v57, %v871_v54  ;;  %v876_v28 = vor.u32 %v875_v62, %v874_v61  ;;  %v2224_v2 = vshll.u32 %v853_v40, 8  ;;  %vm1875_vm9 = vcmp.lt.s32.totalorder %v1874_v48, 0 }
  0xce   : > { %v790_v60 = vadd.s32 536870912, %v789_v49  ;;  %vm880_vm10 = vcmp.lt.s32.totalorder %v2206_v50, 4  ;;  %v885_v30 = vsel %vm877_vm8, %v2209_v51, %v2211_v52  ;;  %vm879_vm11 = vcmp.lt.s32.totalorder %v2206_v50, 3 }
  0xcf   : > { %v886_v38 = vsel %vm880_vm10, %v873_v63, 920167782  ;;  %v889_v7 = vsel %vm877_vm8, %v2211_v52, %v2216_v26  ;;  %vm878_vm12 = vcmp.lt.s32.totalorder %v2206_v50, 2  ;;  %v890_v10 = vsel %vm880_vm10, %v876_v28, 1326507024 }
  0xd0   : > { %v2221_v0 = vshrl.u32 %v790_v60, 30  ;;  %v887_v9 = vsel %vm879_vm11, %v2216_v26, %v886_v38  ;;  %v891_v12 = vsel %vm879_vm11, %v873_v63, %v890_v10  ;;  %v894_v16 = vand.u32 65535, %v2224_v2 }
  0xd1   : > { %v888_v11 = vsel %vm878_vm12, %v885_v30, %v887_v9  ;;  %v2252_v59 = vsel %vm1875_vm9, 0, %v1874_v48  ;;  %v892_v17 = vsel %vm878_vm12, %v889_v7, %v891_v12  ;;  %v895_v27 = vshrl.u32 %v2224_v2, 16 }
  0xd2   : > { %v792_v35 = vshll.u32 %v2221_v0, 30  ;;  %v918_v18 = vand.u32 65535, %v888_v11  ;;  %v919_v20 = vshrl.u32 %v888_v11, 16  ;;  %v896_v23 = vand.u32 65535, %v892_v17 }
  0xd3   : > { %v897_v25 = vshrl.u32 %v892_v17, 16  ;;  %v651_v55 = vsub.s32 4294967266, %v2252_v59  ;;  %v631_v9 = vadd.s32 %v2107_v44, %v2125_v58  ;;  %v647_v10 = vsub.s32 32, %v2252_v59 }
  0xd4   : > { %v2245_v1 = vsub.s32 %v789_v49, %v792_v35  ;;  %v921_v19 = vmul.u32 %v919_v20, %v894_v16  ;;  %v900_v34 = vmul.u32 %v896_v23, %v895_v27  ;;  %v898_v37 = vmul.u32 %v896_v23, %v894_v16 }
  0xd5   : > { %v899_v32 = vmul.u32 %v897_v25, %v894_v16  ;;  %v920_v40 = vmul.u32 %v918_v18, %v894_v16  ;;  %v901_v45 = vmul.u32 %v897_v25, %v895_v27  ;;  %v922_v41 = vmul.u32 %v918_v18, %v895_v27 }
  0xd6   : > { %vm794_vm13 = vcmp.lt.s32.totalorder %v2245_v1, 0  ;;  %v795_v22 = vsub.s32 0, %v2245_v1  ;;  %v924_v42 = vshll.u32 %v921_v19, 16  ;;  %v904_v46 = vshll.u32 %v900_v34, 16 }
  0xd7   : > { %v902_v21 = vshll.u32 %v899_v32, 16  ;;  %v652_v48 = vadd.s32 127, %v651_v55  ;;  %v923_v60 = vmul.u32 %v919_v20, %v895_v27  ;;  %v903_v62 = vshrl.u32 %v899_v32, 16 }
  0xd8   : > { %v796_v31 = vsel %vm794_vm13, %v795_v22, %v2245_v1  ;;  %vm928_vm15 = vc.u32 %v920_v40, %v924_v42  ;;  %v926_v28 = vshll.u32 %v922_v41, 16  ;;  %v930_v7 = vadd.s32 %v924_v42, %v920_v40 }
  0xd9   : > { %v797_v33 = vclz %v796_v31  ;;  %vm906_vm14 = vc.u32 %v898_v37, %v902_v21  ;;  %v908_v47 = vadd.s32 %v902_v21, %v898_v37  ;;  %v929_v8 = vsel %vm928_vm15, 1, %v1969_v4 }
  0xda   : > { %v907_v49 = vsel %vm906_vm14, 1, %v1969_v4  ;;  %v931_v35 = vadd.s32 %v929_v8, %v923_v60  ;;  %v785_v11 = vadd.s32 %v2187_v29, %v2185_v39  ;;  %v861_v16 = vshrl.u32 %v1970_v24, %v2195_v56 }
  0xdb   : > { %v1877_v43 = vadd.s32 4294967294, %v797_v33  ;;  %v909_v57 = vadd.s32 %v907_v49, %v901_v45  ;;  %vm910_vm1 = vc.u32 %v908_v47, %v904_v46  ;;  %v882_v17 = vsel %vm880_vm10, %v2216_v26, 2102212464 }
  0xdc   : > { %v911_v63 = vsel %vm910_vm1, 1, %v1969_v4  ;;  %vm932_vm2 = vc.u32 %v930_v7, %v926_v28  ;;  %v653_v20 = vshll.u32 %v652_v48, 23  ;;  %v905_v23 = vshrl.u32 %v900_v34, 16 }
  0xdd   : > { %vm1878_vm0 = vcmp.lt.s32.totalorder %v1877_v43, 0  ;;  %v913_v38 = vadd.s32 %v911_v63, %v909_v57  ;;  %v933_v44 = vsel %vm932_vm2, 1, %v1969_v4  ;;  %v925_v25 = vshrl.u32 %v921_v19, 16 }
  0xde   : > { %v800_v54 = vsel %vm1878_vm0, 0, %v1877_v43  ;;  %v935_v27 = vadd.s32 %v933_v44, %v931_v35  ;;  %v649_v31 = vshrl.u32 %v631_v9, %v647_v10  ;;  %v881_v39 = vsel %vm877_vm8, %v861_v16, %v2209_v51 }
  0xdf   : > { %v805_v61 = vsub.s32 4294967266, %v800_v54  ;;  %v801_v30 = vsub.s32 32, %v800_v54  ;;  %v914_v18 = vadd.s32 %v913_v38, %v903_v62  ;;  %v883_v24 = vsel %vm879_vm11, %v2211_v52, %v882_v17 }
  0xe0   : > { %v802_v56 = vshll.u32 %v2245_v1, %v800_v54  ;;  %v927_v32 = vshrl.u32 %v922_v41, 16  ;;  %v936_v55 = vadd.s32 %v935_v27, %v925_v25  ;;  %v648_v4 = vshll.u32 %v2165_v53, %v2252_v59 }
  0xe1   : > { %v806_v12 = vadd.s32 127, %v805_v61  ;;  %v803_v58 = vshrl.u32 %v785_v11, %v801_v30  ;;  %v915_v29 = vadd.s32 %v914_v18, %v905_v23  ;;  %v654_v19 = vor.u32 4788187, %v653_v20 }
  0xe2   : > { %v934_v33 = vadd.s32 %v930_v7, %v926_v28  ;;  %v884_v37 = vsel %vm878_vm12, %v881_v39, %v883_v24  ;;  %v937_v51 = vadd.s32 %v936_v55, %v927_v32  ;;  %v650_v21 = vor.u32 %v649_v31, %v648_v4 }
  0xe3   : > { %v807_v22 = vshll.u32 %v806_v12, 23  ;;  %v804_v34 = vor.u32 %v803_v58, %v802_v56  ;;  %v655_v42 = vand.u32 2147483647, %v654_v19  ;;  %v938_v1 = vmul.u32 %v2224_v2, %v884_v37 }
  0xe4   : > { %vm940_vm3 = vc.u32 %v915_v29, %v934_v33  ;;  %v941_v52 = vadd.s32 1, %v937_v51  ;;  %v657_v41 = vcvt.s32.f32 %v650_v21  ;;  %vm539_vm5 = vcmp.lt.s32.totalorder %v2062_v5, 0 }
  0xe5   : > { %v808_v26 = vor.u32 4788187, %v807_v22  ;;  %v811_v43 = vcvt.s32.f32 %v804_v34  ;;  %vm2298_vm7 = vcmp.le.f32.partialorder %v691_v15, 0.7853982  ;;  %vm2304_vm8 = vcmp.le.f32.partialorder %v537_v6, 0.7853982 }
  0xe6   : > { %v942_v45 = vsel %vm940_vm3, %v941_v52, %v937_v51  ;;  %v658_v53 = vmul.f32 %v657_v41, %v655_v42  ;;  %v939_v9 = vadd.s32 %v934_v33, %v915_v29  ;;  %v815_v29 = vsub.s32 4, %v2221_v0 }
  0xe7   : > { %v809_v40 = vand.u32 2147483647, %v808_v26  ;;  %v943_v46 = vadd.s32 %v942_v45, %v938_v1  ;;  %v661_v32 = vsub.s32 4, %v2162_v36  ;;  %vm847_vm10 = vcmp.lt.s32.totalorder %v2142_v14, 0 }
  0xe8   : > { %v659_v50 = vxor.u32 2147483648, %v658_v53  ;;  %v816_v34 = vsel %vm693_vm4, %v815_v29, %v2221_v0  ;;  %vm2342_vm11 = vcmp.le.f32.partialorder %v845_v3, 0.7853982 }
  0xe9   : > { %v812_v47 = vmul.f32 %v811_v43, %v809_v40  ;;  %v944_v59 = vadd.s32 536870912, %v943_v46  ;;  %v662_v40 = vsel %vm539_vm5, %v661_v32, %v2162_v36  ;;  %v818_v36 = vsel %vm2298_vm7, 0, %v816_v34 }
  0xea   : > { %v660_v57 = vsel %vm539_vm5, %v659_v50, %v658_v53  ;;  %v664_v41 = vsel %vm2304_vm8, 0, %v662_v40  ;;  %v1298_v50 = vadd.s32 3, %v818_v36 }
  0xeb   : > { %v2287_v48 = vshrl.u32 %v944_v59, 30  ;;  %v813_v49 = vxor.u32 2147483648, %v812_v47  ;;  %v2316_v30 = vsel %vm2304_vm8, %v2062_v5, %v660_v57 }
  0xec   : > { %v2322_v6 = vmul.f32 %v2316_v30, %v2316_v30 }
  0xed   : > { %v946_v8 = vshll.u32 %v2287_v48, 30  ;;  %v814_v2 = vsel %vm693_vm4, %v813_v49, %v812_v47  ;;  %v969_v51 = vsub.s32 4, %v2287_v48 }
  0xee   : > { %v2311_v63 = vsel %vm2298_vm7, %v2068_v13, %v814_v2  ;;  %v673_v16 = vmul.f32 -0.00019511016, %v2322_v6  ;;  %v666_v31 = vmul.f32 -0.001358992, %v2322_v6  ;;  %v1143_v2 = vadd.s32 3, %v664_v41 }
  0xef   : > { %v947_v54 = vsub.s32 %v943_v46, %v946_v8  ;;  %v819_v35 = vmul.f32 %v2311_v63, %v2311_v63  ;;  %v970_v46 = vsel %vm847_vm10, %v969_v51, %v2287_v48  ;;  %v1556_v8 = vld [vmem:[%s2360_s26 + $0x8] sm:$0xff] }
  0xf0   : > { %v674_v25 = vadd.f32 0.008332121, %v673_v16  ;;  %v667_v19 = vadd.f32 0.041655596, %v666_v31  ;;  %1566 = vperm.xlu1 %1943, %v1556_v8   ;;  %v972_v57 = vsel %vm2342_vm11, 0, %v970_v46  ;;  %v1464_v8 = vld [vmem:[%s2438_s15] sm:$0xff] }
  0xf1   : > { %vm948_vm6 = vcmp.lt.s32.totalorder %v947_v54, 0  ;;  %v949_v60 = vsub.s32 0, %v947_v54  ;;  %v827_v12 = vmul.f32 -0.00019511016, %v819_v35  ;;  %v820_v58 = vmul.f32 -0.001358992, %v819_v35 }
  0xf2   : > { %v675_v55 = vmul.f32 %v674_v25, %v2322_v6  ;;  %v668_v43 = vmul.f32 %v667_v19, %v2322_v6  ;;  %v1555_v25 = vld [vmem:[%s2360_s26] sm:$0xff] }
  0xf3   : > { %v950_v28 = vsel %vm948_vm6, %v949_v60, %v947_v54  ;;  %v828_v44 = vadd.f32 0.008332121, %v827_v12  ;;  %v821_v26 = vadd.f32 0.041655596, %v820_v58  ;;  %v2379_v12 = vand.u32 3, %v664_v41 }
  0xf4   : > { %v951_v15 = vclz %v950_v28  ;;  %v676_v52 = vadd.f32 -0.16666654, %v675_v55  ;;  %v989_v58 = vand.u32 3, %v972_v57 }
  0xf5   : > { %v829_v56 = vmul.f32 %v828_v44, %v819_v35  ;;  %v822_v21 = vmul.f32 %v821_v26, %v819_v35  ;;  %vm683_vm4 = vcmp.eq.s32.totalorder %v2379_v12, 0  ;;  %vm682_vm6 = vcmp.lt.s32.totalorder %v2379_v12, 2 }
  0xf6   : > { %v1880_v38 = vadd.s32 4294967294, %v951_v15  ;;  %v677_v53 = vmul.f32 %v676_v52, %v2322_v6  ;;  %v2373_v15 = vand.u32 3, %v818_v36  ;;  %vm686_vm8 = vcmp.eq.s32.totalorder %v2379_v12, 2 }
  0xf7   : > { %v830_v37 = vadd.f32 -0.16666654, %v829_v56  ;;  %v823_v47 = vadd.f32 -0.4999988, %v822_v21  ;;  %vm994_vm14 = vcmp.eq.s32.totalorder %v989_v58, 2 }
  0xf8   : > { %vm1881_vm9 = vcmp.lt.s32.totalorder %v1880_v38, 0  ;;  %v678_v48 = vadd.f32 1.0, %v677_v53  ;;  %vm837_vm12 = vcmp.eq.s32.totalorder %v2373_v15, 0  ;;  %vm840_vm13 = vcmp.eq.s32.totalorder %v2373_v15, 2  ;;  %1561 = vperm.xlu1 %1943, %v1555_v25  }
  0xf9   : > { %v954_v7 = vsel %vm1881_vm9, 0, %v1880_v38  ;;  %v831_v45 = vmul.f32 %v830_v37, %v819_v35  ;;  %v824_v28 = vmul.f32 %v823_v47, %v819_v35  ;;  %vm990_vm9 = vcmp.lt.s32.totalorder %v989_v58, 2 }
  0xfa   : > { %v955_v10 = vsub.s32 32, %v954_v7  ;;  %v959_v11 = vsub.s32 4294967266, %v954_v7  ;;  %v956_v17 = vshll.u32 %v947_v54, %v954_v7  ;;  %v669_v54 = vadd.f32 -0.4999988, %v668_v43 }
  0xfb   : > { %v832_v62 = vadd.f32 1.0, %v831_v45  ;;  %v1591_v45 = vld [vmem:[%s2417_s29] sm:$0xff] }
  0xfc   : > { %v957_v18 = vshrl.u32 %v939_v9, %v955_v10  ;;  %v960_v20 = vadd.s32 127, %v959_v11  ;;  %v2375_v9 = vand.u32 3, %v1298_v50  ;;  %v1453_v10 = vadd.s32 3, %v972_v57  ;;  %v1592_v57 = vld [vmem:[%s2417_s29 + $0x8] sm:$0xff] }
  0xfd   : > { %v2377_v11 = vand.u32 3, %v1143_v2  ;;  %v670_v35 = vmul.f32 %v669_v54, %v2322_v6  ;;  %v1468_v54 = vld [vmem:[%s2444_s18] sm:$0xff] }
  0xfe   : > { %v958_v22 = vor.u32 %v957_v18, %v956_v17  ;;  %v961_v23 = vshll.u32 %v960_v20, 23  ;;  %v833_v18 = vmul.f32 %v832_v62, %v2311_v63  ;;  %v825_v20 = vadd.f32 1.0, %v824_v28  ;;  %v1558_v63 = vld [vmem:[%s2360_s26 + $0x18] sm:$0xff]  ;;  %v1470_v62 = vld [vmem:[%s2444_s18 + $0x10] sm:$0xff] }
  0xff   : > { %vm1301_vm15 = vcmp.eq.s32.totalorder %v2375_v9, 0  ;;  %v1454_v6 = vand.u32 3, %v1453_v10  ;;  %vm1304_vm2 = vcmp.eq.s32.totalorder %v2375_v9, 2  ;;  %vm1146_vm3 = vcmp.eq.s32.totalorder %v2377_v11, 0  ;;  %1576 = vperm.xlu0 %1942, %v1558_v63   ;;  %v1467_v28 = vld [vmem:[%s2438_s15 + $0x18] sm:$0xff] }
 0x100   : > { %v962_v27 = vor.u32 4788187, %v961_v23  ;;  %v965_v24 = vcvt.s32.f32 %v958_v22  ;;  %v679_v22 = vmul.f32 %v678_v48, %v2316_v30  ;;  %v838_v31 = vxor.u32 2147483648, %v833_v18  ;;  %1597 = vperm.xlu1 %1943, %v1591_v45  }
 0x101   : > { %vm1145_vm5 = vcmp.lt.s32.totalorder %v2377_v11, 2  ;;  %vm1149_vm7 = vcmp.eq.s32.totalorder %v2377_v11, 2  ;;  %vm1456_vm1 = vcmp.eq.s32.totalorder %v1454_v6, 0  ;;  %vm1459_vm0 = vcmp.eq.s32.totalorder %v1454_v6, 2 }
 0x102   : > { %v963_v39 = vand.u32 2147483647, %v962_v27  ;;  %v684_v29 = vxor.u32 2147483648, %v679_v22  ;;  %v1303_v55 = vsel %vm1301_vm15, %v825_v20, %v838_v31 }
 0x104   : > { %v966_v4 = vmul.f32 %v965_v24, %v963_v39  ;;  %v671_v39 = vadd.f32 1.0, %v670_v35  ;;  %v841_v24 = vxor.u32 2147483648, %v825_v20 }
 0x106   : > { %v967_v33 = vxor.u32 2147483648, %v966_v4  ;;  %v687_v19 = vxor.u32 2147483648, %v671_v39  ;;  %v842_v34 = vsel %vm840_vm13, %v841_v24, %v833_v18  ;;  %v1148_v37 = vsel %vm1146_vm3, %v671_v39, %v684_v29 }
 0x107   : > { %v685_v51 = vsel %vm683_vm4, %v671_v39, %v684_v29  ;;  %vm2521_vm13 = vcmp.lt.s32.totalorder %v2373_v15, 2  ;;  %v1471_v15 = vld [vmem:[%s2444_s18 + $0x18] sm:$0xff]  ;;  %vm1615_vm3 = vcmask 261120  }
 0x108   : > { %v968_v0 = vsel %vm847_vm10, %v967_v33, %v966_v4  ;;  %vm991_vm10 = vcmp.eq.s32.totalorder %v989_v58, 0  ;;  %v839_v4 = vsel %vm837_vm12, %v825_v20, %v838_v31  ;;  %v1306_v33 = vsel %vm1304_vm2, %v841_v24, %v833_v18 }
 0x109   : > { %v2351_v1 = vsel %vm2342_vm11, %v2142_v14, %v968_v0  ;;  %vm1455_vm11 = vcmp.lt.s32.totalorder %v1454_v6, 2  ;;  %v1557_v0 = vld [vmem:[%s2360_s26 + $0x10] sm:$0xff]  ;;  %vm2520_vm12 = vcmp.lt.s32.totalorder %v2375_v9, 2  ;;  %v1151_v47 = vsel %vm1149_vm7, %v687_v19, %v679_v22  ;;  %s485_s26 = scalar_lea.vmem %s2512_s8, %s2477_s22 }
 0x10a   : > { %v973_v3 = vmul.f32 %v2351_v1, %v2351_v1  ;;  %v1307_v43 = vsel %vm2520_vm12, %v1303_v55, %v1306_v33  ;;  %1571 = vperm.xlu0 %1942, %v1557_v0   ;;  %v688_v53 = vsel %vm686_vm8, %v687_v19, %v679_v22  ;;  %vm1472_vm2 = vcmask 195584   ;;  %v1662_v55 = vld [vmem:[%s485_s26] sm:$0x7]  ;;  %v1590_v19 = vld [vmem:[%s472_s21 + $0x18] sm:$0xff] }
 0x10c   : > { %v974_v59 = vmul.f32 -0.001358992, %v973_v3  ;;  %v981_v49 = vmul.f32 -0.00019511016, %v973_v3 }
 0x10e   : > { %v975_v60 = vadd.f32 0.041655596, %v974_v59  ;;  %v982_v61 = vadd.f32 0.008332121, %v981_v49  ;;  %v689_v59 = vsel %vm682_vm6, %v685_v51, %v688_v53 }
 0x110   : > { %v976_v38 = vmul.f32 %v975_v60, %v973_v3  ;;  %v983_v7 = vmul.f32 %v982_v61, %v973_v3  ;;  %v1465_v60 = vld [vmem:[%s2438_s15 + $0x8] sm:$0xff] }
 0x111   : > { %v1469_v61 = vld [vmem:[%s2444_s18 + $0x8] sm:$0xff] }
 0x112   : > { %v977_v16 = vadd.f32 -0.4999988, %v976_v38  ;;  %v984_v17 = vadd.f32 -0.16666654, %v983_v7  ;;  %1602 = vperm.xlu0 %1942, %v1592_v57  }
 0x114   : > { %v978_v23 = vmul.f32 %v977_v16, %v973_v3  ;;  %v985_v44 = vmul.f32 %v984_v17, %v973_v3  ;;  %v843_v3 = vsel %vm2521_vm13, %v839_v4, %v842_v34  ;;  %v1589_v4 = vld [vmem:[%s472_s21 + $0x10] sm:$0xff] }
 0x116   : > { %v979_v30 = vadd.f32 1.0, %v978_v23  ;;  %v986_v27 = vadd.f32 1.0, %v985_v44 }
 0x118   : > { %v987_v56 = vmul.f32 %v986_v27, %v2351_v1  ;;  %v995_v26 = vxor.u32 2147483648, %v979_v30  ;;  %v1594_v27 = vld [vmem:[%s2417_s29 + $0x18] sm:$0xff] }
 0x119   : > { %1612 = vperm.xlu2 %1944, %v1594_v27  }
 0x11a   : > { %v992_v32 = vxor.u32 2147483648, %v987_v56  ;;  %v1461_v40 = vsel %vm1459_vm0, %v995_v26, %v987_v56  ;;  %v996_v42 = vsel %vm994_vm14, %v995_v26, %v987_v56  ;;  %vm2522_vm14 = vweird.f32 %v2142_v14  ;;  %v1587_v56 = vld [vmem:[%s472_s21] sm:$0xff]  ;;  %v1593_v26 = vld [vmem:[%s2417_s29 + $0x10] sm:$0xff] }
 0x11b   : > { %vm2523_vm15 = vmmov %vm2522_vm14  ;;  %vm834_vm0 = vweird.f32 %v2068_v13  ;;  %v1152_v14 = vsel %vm1145_vm5, %v1148_v37, %v1151_v47  ;;  %v1661_v47 = vld [vmem:[%s481_s27] sm:$0x7] }
 0x11c   : > { %v1458_v21 = vsel %vm1456_vm1, %v979_v30, %v992_v32  ;;  %v993_v52 = vsel %vm991_vm10, %v979_v30, %v992_v32  ;;  %v1308_v49 = vsel %vm834_vm0, nan, %v1307_v43  ;;  %v844_v50 = vsel %vm834_vm0, nan, %v843_v3  ;;  %v1588_v32 = vld [vmem:[%s472_s21 + $0x8] sm:$0xff] }
 0x11d   : > { %v1462_v1 = vsel %vm1455_vm11, %v1458_v21, %v1461_v40  ;;  %v997_v36 = vsel %vm990_vm9, %v993_v52, %v996_v42  ;;  %vm680_vm1 = vweird.f32 %v2062_v5  ;;  %v1466_v5 = vld [vmem:[%s2438_s15 + $0x10] sm:$0xff] }
 0x11e   : > { %v1463_v41 = vsel %vm2522_vm14, nan, %v1462_v1  ;;  %v998_v46 = vsel %vm2523_vm15, nan, %v997_v36  ;;  %v1153_v13 = vsel %vm680_vm1, nan, %v1152_v14  ;;  %v690_v2 = vsel %vm680_vm1, nan, %v689_v59 }
 0x11f   : > { %1498 = vmatpush.msra.mxu1 %v1463_v41  ;;  %1539 = vmatpush.msra.mxu2 %v998_v46 }
 0x121   : > { %1499 = vmatpush.msra.mxu1 %v1308_v49  ;;  %1540 = vmatpush.msra.mxu2 %v844_v50 }
 0x122   : > { %1607 = vperm.xlu2 %1944, %v1593_v26  }
 0x123   : > { %1500 = vmatpush.msra.mxu1 %v1153_v13  ;;  %1541 = vmatpush.msra.mxu2 %v690_v2 }
 0x124   : > { %1895 = vmatmul.msk.f32.vlgmr.msra.gmra.mxu2 %vm1472_vm2, %v1464_v8  ;;  %1891 = vmatmul.msk.f32.vlgmr.msra.gmra.mxu1 %vm1472_vm2, %v1468_v54 }
 0x12a   : > { %1665 = vperm.xlu2 %1944, %v1662_v55  }
 0x12c   : > { %1896 = vmatmul.msk.f32.gmra.mxu2 %vm1472_vm2, %v1465_v60  ;;  %1892 = vmatmul.msk.f32.gmra.mxu1 %vm1472_vm2, %v1469_v61 }
 0x134   : > { %1897 = vmatmul.msk.f32.gmra.mxu2 %vm1472_vm2, %v1466_v5  ;;  %1893 = vmatmul.msk.f32.gmra.mxu1 %vm1472_vm2, %v1470_v62 }
 0x13c   : > { %1898 = vmatmul.msk.f32.gmra.mxu2 %vm1472_vm2, %v1467_v28  ;;  %1894 = vmatmul.msk.f32.gmra.mxu1 %vm1472_vm2, %v1471_v15 }
 0x162   : > { %v1567_v16 = vpop.permute.xlu1 %1566 }
 0x16a   : > { %v1562_v63 = vpop.permute.xlu1 %1561 }
 0x171   : > { %v1577_v11 = vpop.permute.xlu0 %1576 }
 0x172   : > { %v1598_v43 = vpop.permute.xlu1 %1597 }
 0x173   : > { %v1613_v37 = vpop.permute.xlu2 %1612 }
 0x17c   : > { %v1572_v23 = vpop.permute.xlu0 %1571  ;;  %v1608_v21 = vpop.permute.xlu2 %1607 }
 0x184   : > { %v1603_v0 = vpop.permute.xlu0 %1602  ;;  %v1666_v53 = vpop.permute.xlu2 %1665 }
 0x1a1   : > { %v1502_v48 = vpop.f32.mrf.mxu1 }
 0x1a7   : > { %v1543_v38 = vpop.f32.mrf.mxu2 }
 0x1a8   : > { %v1544_v44 = vadd.f32 %v1543_v38, %v1502_v48 }
 0x1a9   : > { %v1505_v7 = vpop.f32.mrf.mxu1 }
 0x1aa   : > { %v1579_v31 = vadd.f32 %v1562_v63, %v1544_v44 }
 0x1ac   : > { %v1583_v29 = vmax.f32 %v1579_v31, 0.0 }
 0x1af   : > { %v1546_v9 = vpop.f32.mrf.mxu2 }
 0x1b0   : > { %v1547_v20 = vadd.f32 %v1546_v9, %v1505_v7 }
 0x1b1   : > { %v1508_v10 = vpop.f32.mrf.mxu1 }
 0x1b2   : > { %v1580_v30 = vadd.f32 %v1567_v16, %v1547_v20 }
 0x1b4   : > { %v1584_v24 = vmax.f32 %v1580_v30, 0.0 }
 0x1b7   : > { %v1549_v12 = vpop.f32.mrf.mxu2 }
 0x1b8   : > { %v1550_v18 = vadd.f32 %v1549_v12, %v1508_v10 }
 0x1b9   : > { %v1511_v17 = vpop.f32.mrf.mxu1 }
 0x1ba   : > { %v1581_v25 = vadd.f32 %v1572_v23, %v1550_v18 }
 0x1bc   : > { %v1585_v39 = vmax.f32 %v1581_v25, 0.0 }
 0x1bf   : > { %v1552_v35 = vpop.f32.mrf.mxu2 }
 0x1c0   : > { %v1553_v22 = vadd.f32 %v1552_v35, %v1511_v17 }
 0x1c2   : > { %v1582_v58 = vadd.f32 %v1577_v11, %v1553_v22 }
 0x1c4   : > { %v1586_v6 = vmax.f32 %v1582_v58, 0.0 }
 0x1c6   : > { %1640 = vmatpush.msra.mxu3 %v1586_v6 }
 0x1c8   : > { %1641 = vmatpush.msra.mxu3 %v1585_v39 }
 0x1ca   : > { %1642 = vmatpush.msra.mxu3 %v1584_v24 }
 0x1cc   : > { %1643 = vmatpush.msra.mxu3 %v1583_v29 }
 0x1cd   : > { %1899 = vmatmul.msk.f32.vlgmr.msra.gmra.mxu3 %vm1615_vm3, %v1587_v56 }
 0x1d5   : > { %1900 = vmatmul.msk.f32.gmra.mxu3 %vm1615_vm3, %v1588_v32 }
 0x1dd   : > { %1901 = vmatmul.msk.f32.gmra.mxu3 %vm1615_vm3, %v1589_v4 }
 0x1e5   : > { %1902 = vmatmul.msk.f32.gmra.mxu3 %vm1615_vm3, %v1590_v19 }
 0x250   : > { %v1645_v33 = vpop.f32.mrf.mxu3 }
 0x251   : > { %v1646_v3 = vadd.f32 %v1645_v33, %v1598_v43 }
 0x253   : > { %v1657_v46 = vmax.f32 %v1646_v3, 0.0 }
 0x258   : > { %v1648_v34 = vpop.f32.mrf.mxu3 }
 0x259   : > { %v1649_v1 = vadd.f32 %v1648_v34, %v1603_v0 }
 0x25b   : > { %v1658_v41 = vmax.f32 %v1649_v1, 0.0 }
 0x260   : > { %v1651_v51 = vpop.f32.mrf.mxu3 }
 0x261   : > { %v1652_v52 = vadd.f32 %v1651_v51, %v1608_v21 }
 0x263   : > { %v1659_v45 = vmax.f32 %v1652_v52, 0.0 }
 0x268   : > { %v1654_v40 = vpop.f32.mrf.mxu3 }
 0x269   : > { %v1655_v42 = vadd.f32 %v1654_v40, %v1613_v37 }
 0x26b   : > { %v1660_v36 = vmax.f32 %v1655_v42, 0.0 }
 0x26d   : > { %1683 = vmatpush.msrb.mxu0 %v1660_v36 }
 0x26f   : > { %1684 = vmatpush.msrb.mxu0 %v1659_v45 }
 0x271   : > { %1685 = vmatpush.msrb.mxu0 %v1658_v41 }
 0x273   : > { %1686 = vmatpush.msrb.mxu0 %v1657_v46 }
 0x274   : > { %1903 = vmatmul.msk.f32.vlgmr.msrb.gmra.mxu0 %vm1615_vm3, %v1661_v47 }
 0x2f1   : > { %v1688_v14 = vpop.f32.mrf.mxu0 }
 0x2f2   : > { %v1689_v59 = vadd.f32 %v1688_v14, %v1666_v53 }
 0x2f4   : > { %1691 = vst [vmem:[%s492_s13] sm:$0x7] %v1689_v59 }
 0x2f5 PF: > { %s19_s11 = sadd.s32 1, %s1967_s11   ;;  %s2524_s30 = smov %s1963_s10 }
 0x2f6   : > { %p16_p5 = scmp.ge.s32.totalorder %s19_s11, 4   ;;  %s2525_s10 = smov %s2527_s12 }
 0x2f8   :  { %18 = sbr.rel (!%p16_p5) target bundleno = 2 (0x2), region = 107 }

</bundles_post_ra>
